<compile_context>
chip_gen: v5e
topology: v5e:2x2
jax: 0.10.0
libtpu: 0.0.40
codegen_flags: <defaults>
</compile_context>

<pallas_src>
import functools

import jax
import jax.numpy as jnp
from jax.experimental import pallas as pl
from jax.experimental.pallas import tpu as pltpu


def _round_up(x: int, m: int) -> int:
    return ((x + m - 1) // m) * m


def _gelu_fast(x):
    # HF "gelu_fast": 0.5*x*(1 + tanh(0.7978845608 * x * (1 + 0.044715*x*x)))
    return 0.5 * x * (1.0 + jnp.tanh(0.7978845608028654 * x * (1.0 + 0.044715 * x * x)))


def _kernel(x_ref, w_ref, b_ref, o_ref):
    # x_ref: (tm, H) input dtype (e.g. f32) -- cast to the MXU compute dtype here,
    #        so the HBM read of x happens exactly once and at its native width.
    # w_ref: (H, I)  compute dtype (bf16), resident in VMEM for the whole grid.
    # b_ref: (1, I)  f32, resident.
    # o_ref: (tm, I) output dtype.
    x = x_ref[...].astype(w_ref.dtype)
    acc = jnp.dot(x, w_ref[...], preferred_element_type=jnp.float32)
    acc = acc + b_ref[...]          # broadcast add, f32
    acc = _gelu_fast(acc)           # f32 GELU (tanh approx)
    # TODO(synk): dropout is a no-op at inference (hidden_dropout_prob = 0.0);
    # no RNG masking emitted.
    o_ref[...] = acc.astype(o_ref.dtype)


@functools.partial(jax.jit, static_argnames=("tm", "compute_dtype", "out_dtype"))
def vivit_intermediate(
    hidden_states,
    weight,
    bias,
    *,
    tm: int | None = None,
    compute_dtype=jnp.bfloat16,
    out_dtype=None,
):
    """hidden_states: (B, S, H); weight: (H, I) = W^T; bias: (I,) -> (B, S, I)."""
    B, S, H = hidden_states.shape
    H2, I = weight.shape
    assert H == H2
    M = B * S

    if out_dtype is None:
        out_dtype = hidden_states.dtype   # pass out_dtype=jnp.bfloat16 if the
                                          # downstream VivitOutput accepts bf16
                                          # (halves the dominant HBM write term).

    # M tile: sublane-aligned; 512 keeps the per-step footprint ~24 MiB with the
    # full-width f32 output (fits v7x's 64 MiB VMEM; v5e/v6e have headroom).
    if tm is None:
        tm = min(512, _round_up(M, 8))

    x2d = hidden_states.reshape(M, H)          # no dtype cast, no padding copy
    # Weight/bias are tiny (<= 9 MiB); casting here is negligible.  If weights
    # are static across calls, stash the bf16 copy outside the jit instead.
    w = weight.astype(compute_dtype)
    b2d = bias.astype(jnp.float32).reshape(1, I)

    grid = (pl.cdiv(M, tm),)

    out = pl.pallas_call(
        _kernel,
        out_shape=jax.ShapeDtypeStruct((M, I), out_dtype),
        grid=grid,
        in_specs=[
            pl.BlockSpec((tm, H), lambda i: (i, 0)),   # x: streamed once over M
            pl.BlockSpec((H, I), lambda i: (0, 0)),    # W: resident, fetched once
            pl.BlockSpec((1, I), lambda i: (0, 0)),    # bias: resident
        ],
        out_specs=pl.BlockSpec((tm, I), lambda i: (i, 0)),
        compiler_params=pltpu.CompilerParams(
            # Single M axis, every output tile independent -> fully parallel
            # (lets v7x shard the row loop across its 2 TensorCores).
            dimension_semantics=("parallel",),
            # Explicit scoped-VMEM limit: big enough for resident W + f32 out
            # tiles, but <= ~48 MiB so it is safe on v7x (64 MiB physical) and
            # raises v5e's 16 MiB default.
            vmem_limit_bytes=48 * 1024 * 1024,
        ),
    )(x2d, w, b2d)

    return out.reshape(B, S, I)


if __name__ == "__main__":
    # Small config: hidden_size=32, intermediate_size=128, batch=2, seq=8.
    B, S, H, I = 2, 8, 32, 128

    key = jax.random.PRNGKey(0)
    kx, kw, kb = jax.random.split(key, 3)

    hidden_states = jax.random.normal(kx, (B, S, H), dtype=jnp.float32)
    # Deterministic "Linear" parameters (weight stored as (H, I) = W^T).
    weight = jax.random.normal(kw, (H, I), dtype=jnp.float32) * 0.02
    bias = jax.random.normal(kb, (I,), dtype=jnp.float32) * 0.02

    out = vivit_intermediate(hidden_states, weight, bias)
    out = jax.block_until_ready(out)

    # Reference (plain JAX), applying the same bf16 rounding the kernel applies
    # to x and W before the MXU; accumulation, bias add and GELU are f32 in both.
    xb = hidden_states.astype(jnp.bfloat16).astype(jnp.float32).reshape(-1, H)
    wb = weight.astype(jnp.bfloat16).astype(jnp.float32)
    ref = _gelu_fast(xb @ wb + bias).reshape(B, S, I)

    assert out.shape == (B, S, I)
    assert out.dtype == hidden_states.dtype
    assert jnp.allclose(out, ref, atol=1e-3, rtol=1e-3)

    print("KERNEL_OK")
</pallas_src>

<mosaic_0001>
module attributes {stable_mosaic.version = 11 : i64} {
  func.func @_kernel(%arg0: i32, %arg1: memref<16x32xf32, #tpu.memory_space<vmem>>, %arg2: memref<32x128xbf16, #tpu.memory_space<vmem>>, %arg3: memref<1x128xf32, #tpu.memory_space<vmem>>, %arg4: memref<16x128xf32, #tpu.memory_space<vmem>>) attributes {dimension_semantics = [#tpu.dimension_semantics<parallel>], iteration_bounds = array<i64: 1>, scalar_prefetch = 0 : i64, scratch_operands = 0 : i64, tpu.core_type = #tpu.core_type<tc>, window_params = [{transform_indices = @transform_0, window_bounds = array<i64: 16, 32>}, {pipeline_mode = #tpu.pipeline_mode<synchronous>, transform_indices = @transform_1, window_bounds = array<i64: 32, 128>}, {pipeline_mode = #tpu.pipeline_mode<synchronous>, transform_indices = @transform_2, window_bounds = array<i64: 1, 128>}, {transform_indices = @transform_3, window_bounds = array<i64: 16, 128>}]} {
    %c0 = arith.constant 0 : index
    %c0_0 = arith.constant 0 : index
    %0 = vector.load %arg1[%c0, %c0_0] : memref<16x32xf32, #tpu.memory_space<vmem>>, vector<16x32xf32>
    %1 = arith.truncf %0 : vector<16x32xf32> to vector<16x32xbf16>
    %c0_1 = arith.constant 0 : index
    %c0_2 = arith.constant 0 : index
    %2 = vector.load %arg2[%c0_1, %c0_2] : memref<32x128xbf16, #tpu.memory_space<vmem>>, vector<32x128xbf16>
    %cst = arith.constant dense<0.000000e+00> : vector<16x128xf32>
    %3 = tpu.matmul %1, %2, %cst {dimension_numbers = #tpu.dot_dimension_numbers<[1], [0], [0], [1], [0, 0, 1, 1], [], []>} : vector<16x32xbf16>, vector<32x128xbf16>, vector<16x128xf32> -> vector<16x128xf32>
    %c0_3 = arith.constant 0 : index
    %c0_4 = arith.constant 0 : index
    %4 = vector.load %arg3[%c0_3, %c0_4] : memref<1x128xf32, #tpu.memory_space<vmem>>, vector<1x128xf32>
    %5 = vector.broadcast %4 : vector<1x128xf32> to vector<16x128xf32>
    %6 = arith.addf %3, %5 : vector<16x128xf32>
    %cst_5 = arith.constant 5.000000e-01 : f32
    %7 = vector.broadcast %cst_5 : f32 to vector<16x128xf32>
    %8 = arith.mulf %7, %6 : vector<16x128xf32>
    %cst_6 = arith.constant 0.797884583 : f32
    %9 = vector.broadcast %cst_6 : f32 to vector<16x128xf32>
    %10 = arith.mulf %9, %6 : vector<16x128xf32>
    %cst_7 = arith.constant 4.471500e-02 : f32
    %11 = vector.broadcast %cst_7 : f32 to vector<16x128xf32>
    %12 = arith.mulf %11, %6 : vector<16x128xf32>
    %13 = arith.mulf %12, %6 : vector<16x128xf32>
    %cst_8 = arith.constant 1.000000e+00 : f32
    %14 = vector.broadcast %cst_8 : f32 to vector<16x128xf32>
    %15 = arith.addf %14, %13 : vector<16x128xf32>
    %16 = arith.mulf %10, %15 : vector<16x128xf32>
    %17 = math.tanh %16 : vector<16x128xf32>
    %cst_9 = arith.constant 1.000000e+00 : f32
    %18 = vector.broadcast %cst_9 : f32 to vector<16x128xf32>
    %19 = arith.addf %18, %17 : vector<16x128xf32>
    %20 = arith.mulf %8, %19 : vector<16x128xf32>
    %c0_10 = arith.constant 0 : index
    %c0_11 = arith.constant 0 : index
    %21 = vector.load %arg4[%c0_10, %c0_11] : memref<16x128xf32, #tpu.memory_space<vmem>>, vector<16x128xf32>
    tpu.vector_store %arg4[%c0_10, %c0_11], %20 {strides = array<i32>} : memref<16x128xf32, #tpu.memory_space<vmem>>, vector<16x128xf32>,
    return
  }
  func.func @transform_0(%arg0: i32) -> (i32, i32) {
    %c0_i32 = arith.constant 0 : i32
    %c0_i32_0 = arith.constant 0 : i32
    return %arg0, %c0_i32 : i32, i32
  }
  func.func @transform_1(%arg0: i32) -> (i32, i32) {
    %c0_i32 = arith.constant 0 : i32
    %c0_i32_0 = arith.constant 0 : i32
    %c0_i32_1 = arith.constant 0 : i32
    return %c0_i32, %c0_i32_0 : i32, i32
  }
  func.func @transform_2(%arg0: i32) -> (i32, i32) {
    %c0_i32 = arith.constant 0 : i32
    %c0_i32_0 = arith.constant 0 : i32
    %c0_i32_1 = arith.constant 0 : i32
    return %c0_i32, %c0_i32_0 : i32, i32
  }
  func.func @transform_3(%arg0: i32) -> (i32, i32) {
    %c0_i32 = arith.constant 0 : i32
    %c0_i32_0 = arith.constant 0 : i32
    return %arg0, %c0_i32 : i32, i32
  }
}

</mosaic_0001>

<bundles_post_ra>
// kernel: vivit_intermediate.1
= control target key start
LH: loop header
LB: loop body
LE: loop exit
PB: predicated region body
PF: predicated region fallthrough
CT: control target
= control target key end

     0   :  { %s181_s0 = inlined_call_operand.vmem [shape: f32[16,32], index: 0, kind: input, shape index: {}]   ;;  %s182_s1 = inlined_call_operand.vmem [shape: bf16[32,128], index: 1, kind: input, shape index: {}]   ;;  %s183_s2 = inlined_call_operand.vmem [shape: f32[1,128], index: 2, kind: input, shape index: {}]   ;;  %s184_s3 = inlined_call_operand.hbm [shape: f32[16,128], index: 3, kind: output, shape index: {}]  }
   0x1   :  { %v105_v0 = vld [vmem:[%s182_s1 + $0x8] sm:$0xff]  ;;  %v104_v1 = vld [vmem:[%s182_s1] sm:$0xff] }
   0x2   :  { %49 = vmatpush.bf16.msra.mxu0 %v105_v0  ;;  %v16_v2 = vld [vmem:[%s181_s0] sm:$0xff]  ;;  %v17_v3 = vld [vmem:[%s181_s0 + $0x8] sm:$0xff] }
   0x3   :  { %8 = vsyncpa [#allocation3], 0  ;;  %v18_v4 = vpack.c.bf16 %v17_v3, %v16_v2  ;;  %vm39_vm0 = vcmask 261120   ;;  %v109_v5 = vld [vmem:[%s183_s2] ss:$0 sm:$0xff]  ;;  %s140_s0 = smov [#allocation2]  }
   0x4   :  { %s81_s1 = sshll.u32 %s140_s0, 4  ;;  %s83_s23 = sshll.u32 %s184_s3, 4  ;;  %s82_s1 = int_to_ptr.vmem [resolvable:$true] %s81_s1  ;;  %s84_s23 = int_to_ptr.hbm [resolvable:$true] %s83_s23 }
   0x5   :  { %s141_s24 = smov 128   ;;  %s142_s25 = smov 8  }
   0x6   :  { %50 = vmatpush.bf16.msra.mxu0 %v104_v1 }
   0x9   :  { %103 = vmatmul.msk.bf16.vlgmr.msra.gmra.mxu0 %vm39_vm0, %v18_v4 }
  0x86   :  { %v52_v6 = vpop.f32.mrf.mxu0 }
  0x87   :  { %v53_v7 = vadd.f32 %v109_v5, %v52_v6 }
  0x89   :  { %v61_v8 = vmul.f32 0.044715, %v53_v7  ;;  %v59_v10 = vmul.f32 0.7978846, %v53_v7  ;;  %v57_v21 = vmul.f32 0.5, %v53_v7 }
  0x8b   :  { %v63_v9 = vmul.f32 %v61_v8, %v53_v7 }
  0x8d   :  { %v65_v11 = vadd.f32 1.0, %v63_v9 }
  0x8e   :  { %v54_v12 = vpop.f32.mrf.mxu0 }
  0x8f   :  { %v67_v13 = vmul.f32 %v65_v11, %v59_v10  ;;  %v55_v14 = vadd.f32 %v109_v5, %v54_v12 }
  0x91   :  { %110 = vtanh.f32 %v67_v13  ;;  %v62_v15 = vmul.f32 0.044715, %v55_v14  ;;  %v60_v17 = vmul.f32 0.7978846, %v55_v14  ;;  %v58_v25 = vmul.f32 0.5, %v55_v14 }
  0x93   :  { %v64_v16 = vmul.f32 %v62_v15, %v55_v14 }
  0x95   :  { %v66_v18 = vadd.f32 1.0, %v64_v16 }
  0x97   :  { %v111_v19 = vpop.eup %110  ;;  %v68_v20 = vmul.f32 %v66_v18, %v60_v17 }
  0x98   :  { %v71_v22 = vadd.f32 1.0, %v111_v19 }
  0x99   :  { %112 = vtanh.f32 %v68_v20 }
  0x9a   :  { %v73_v23 = vmul.f32 %v71_v22, %v57_v21 }
  0x9c   :  { %75 = vst [vmem:[#allocation2] sm:$0xff] %v73_v23 }
  0x9f   :  { %v113_v24 = vpop.eup %112 }
  0xa0   :  { %v72_v26 = vadd.f32 1.0, %v113_v24 }
  0xa2   :  { %v74_v27 = vmul.f32 %v72_v26, %v58_v25 }
  0xa4   :  { %76 = vst [vmem:[#allocation2 + $0x8] sm:$0xff] %v74_v27 }
  0xa5   :  { %89 = dma.vmem_to_hbm [thread:$0]  %s82_s1, 256, %s84_s23, [#allocation3], %s141_s24, %s141_s24, %s142_s25  }
  0xa6   :  { %138 = dma.done.wait [#allocation3], 256  }
  0xa7   :  { %139 = vsyncadd [#allocation3], 4294967040 }
  0xa8   :  { %94 = vsyncpa [#allocation3], 1 }

</bundles_post_ra>
